<compile_context>
chip_gen: v5e
topology: v5e:2x2
jax: 0.10.0
libtpu: 0.0.40
codegen_flags: <defaults>
</compile_context>

<pallas_src>
import functools

import jax
import jax.numpy as jnp
from jax.experimental import pallas as pl
from jax.experimental.pallas import tpu as pltpu


def _sublayer_connection_kernel(x_k_ref, x_res_ref, w_ref, b_ref, a2_ref, b2_ref,
                                o_ref, acc_ref, *, eps):
    # x_k_ref : (tm, tk)  K-slice of the input rows (matmul operand)
    # x_res_ref: (tm, D)  full input rows (residual)
    # w_ref   : (tk, D)   K-slab of the sublayer (linear) weight, y = x @ w
    # b_ref, a2_ref, b2_ref: (1, D) bias / LayerNorm scale / LayerNorm shift
    # acc_ref : (tm, D)   f32 accumulator (persists across the K grid axis)
    k = pl.program_id(1)
    nk = pl.num_programs(1)

    @pl.when(k == 0)
    def _():
        acc_ref[...] = jnp.zeros_like(acc_ref)

    # MXU matmul: operands stay in their native dtype (bf16/f32), f32 accumulation.
    acc_ref[...] += jnp.dot(x_k_ref[...], w_ref[...],
                            preferred_element_type=jnp.float32)

    @pl.when(k == nk - 1)
    def _():
        y = acc_ref[...] + b_ref[...].astype(jnp.float32)
        d = y.shape[-1]
        # Two-pass centered variance (unbiased, /(N-1)) for parity with torch.std.
        mean = jnp.mean(y, axis=-1, keepdims=True)
        centered = y - mean
        var_unbiased = jnp.sum(centered * centered, axis=-1, keepdims=True) / (d - 1)
        std = jnp.sqrt(var_unbiased)
        # (tm, 1) reciprocal on the EUP instead of a (tm, D) divide on the VPU.
        inv = pl.reciprocal(std + eps, approx=True)
        normed = a2_ref[...].astype(jnp.float32) * (centered * inv) \
            + b2_ref[...].astype(jnp.float32)
        # dropout (eval mode) = identity; add the residual in f32, cast on store.
        o_ref[...] = (x_res_ref[...].astype(jnp.float32) + normed).astype(o_ref.dtype)


def sublayer_connection(x, w, b, a2, b2, *, eps=1e-6, tile_m=256, tile_k=512):
    """x: [B, S, D]; w: [D, D]; b, a2, b2: [D]. Returns [B, S, D]."""
    B, S, D = x.shape
    M = B * S
    assert D % 128 == 0, "hidden dim must be lane-dense (multiple of 128)"
    assert M % 8 == 0, "batch*seq must be a multiple of 8 (sublane width)"

    # Pick the largest tile sizes that evenly divide the problem.
    tm = min(tile_m, M)
    while M % tm:
        tm -= 8
    tk = min(tile_k, D)
    while D % tk:
        tk -= 128

    x2 = x.reshape(M, D)
    b_2d = b.reshape(1, D)
    a2_2d = a2.reshape(1, D)
    b2_2d = b2.reshape(1, D)

    kernel = functools.partial(_sublayer_connection_kernel, eps=eps)

    # Rough per-step VMEM footprint (double-buffered pipelined blocks + scratch);
    # raise the scoped-VMEM limit above the 32 MiB default when a large weight slab
    # / big activation tiles need it (relevant for big D, esp. v7x's 64 MiB VMEM).
    itemsize = x.dtype.itemsize
    w_itemsize = w.dtype.itemsize
    vmem_est = (2 * tm * tk * itemsize       # x K-slice (double-buffered)
                + 2 * tm * D * itemsize      # x residual rows (double-buffered)
                + 2 * tk * D * w_itemsize    # weight K-slab (double-buffered)
                + 2 * tm * D * itemsize      # output tile (double-buffered)
                + tm * D * 4                 # f32 accumulator scratch
                + 8 * D * 4)                 # bias / LayerNorm params
    vmem_limit = max(int(vmem_est * 1.5), 32 * 1024 * 1024)

    out = pl.pallas_call(
        kernel,
        out_shape=jax.ShapeDtypeStruct((M, D), x.dtype),
        grid_spec=pltpu.PrefetchScalarGridSpec(
            num_scalar_prefetch=0,
            grid=(M // tm, D // tk),
            in_specs=[
                pl.BlockSpec((tm, tk), lambda i, k: (i, k)),  # x K-slice (matmul)
                pl.BlockSpec((tm, D), lambda i, k: (i, 0)),   # x full rows (residual)
                pl.BlockSpec((tk, D), lambda i, k: (k, 0)),   # weight K-slab
                pl.BlockSpec((1, D), lambda i, k: (0, 0)),    # sublayer bias
                pl.BlockSpec((1, D), lambda i, k: (0, 0)),    # LayerNorm a2
                pl.BlockSpec((1, D), lambda i, k: (0, 0)),    # LayerNorm b2
            ],
            out_specs=pl.BlockSpec((tm, D), lambda i, k: (i, 0)),
            scratch_shapes=[pltpu.VMEM((tm, D), jnp.float32)],
        ),
        compiler_params=pltpu.CompilerParams(
            dimension_semantics=("parallel", "arbitrary"),
            vmem_limit_bytes=vmem_limit),
    )(x2, x2, w, b_2d, a2_2d, b2_2d)

    return out.reshape(B, S, D)


def _reference(x, w, b, a2, b2, eps=1e-6):
    # pure-JAX reference mirroring the PyTorch forward (eval-mode dropout)
    y = jnp.einsum("bsd,de->bse", x.astype(jnp.float32), w.astype(jnp.float32)) + b
    mean = jnp.mean(y, axis=-1, keepdims=True)
    std = jnp.sqrt(jnp.sum((y - mean) ** 2, axis=-1, keepdims=True) / (y.shape[-1] - 1))
    normed = a2 * (y - mean) / (std + eps) + b2
    return (x.astype(jnp.float32) + normed).astype(x.dtype)


if __name__ == "__main__":
    batch, seq, hidden = 2, 8, 128  # lane-dense hidden (multiple of 128)

    key = jax.random.PRNGKey(0)
    kx, kw, kb, ka, kb2 = jax.random.split(key, 5)

    x = jax.random.normal(kx, (batch, seq, hidden), dtype=jnp.float32)
    # deterministic sublayer (Linear(size, size)) parameters
    w = jax.random.normal(kw, (hidden, hidden), dtype=jnp.float32) * 0.02
    b = jax.random.normal(kb, (hidden,), dtype=jnp.float32) * 0.1
    # LayerNorm params (perturbed from the ones/zeros init for a stronger check)
    a2 = 1.0 + 0.1 * jax.random.normal(ka, (hidden,), dtype=jnp.float32)
    b2 = 0.1 * jax.random.normal(kb2, (hidden,), dtype=jnp.float32)

    out = sublayer_connection(x, w, b, a2, b2)
    out = jax.block_until_ready(out)

    ref = _reference(x, w, b, a2, b2)
    assert out.shape == (batch, seq, hidden)
    # Tolerance absorbs the EUP approximate reciprocal (approx=True) and MXU
    # accumulation-order differences; structural bugs would produce O(1) errors.
    assert jnp.allclose(out, ref, atol=2e-2, rtol=2e-2), "mismatch vs reference"

    print("KERNEL_OK")
</pallas_src>

<mosaic_0001>
module attributes {stable_mosaic.version = 11 : i64} {
  func.func @_sublayer_connection_kernel(%arg0: i32, %arg1: i32, %arg2: memref<16x128xf32, #tpu.memory_space<vmem>>, %arg3: memref<16x128xf32, #tpu.memory_space<vmem>>, %arg4: memref<128x128xf32, #tpu.memory_space<vmem>>, %arg5: memref<1x128xf32, #tpu.memory_space<vmem>>, %arg6: memref<1x128xf32, #tpu.memory_space<vmem>>, %arg7: memref<1x128xf32, #tpu.memory_space<vmem>>, %arg8: memref<16x128xf32, #tpu.memory_space<vmem>>, %arg9: memref<16x128xf32, #tpu.memory_space<vmem>>) attributes {dimension_semantics = [#tpu.dimension_semantics<parallel>, #tpu.dimension_semantics<arbitrary>], iteration_bounds = array<i64: 1, 1>, scalar_prefetch = 0 : i64, scratch_operands = 1 : i64, tpu.core_type = #tpu.core_type<tc>, window_params = [{transform_indices = @transform_0, window_bounds = array<i64: 16, 128>}, {transform_indices = @transform_1, window_bounds = array<i64: 16, 128>}, {transform_indices = @transform_2, window_bounds = array<i64: 128, 128>}, {pipeline_mode = #tpu.pipeline_mode<synchronous>, transform_indices = @transform_3, window_bounds = array<i64: 1, 128>}, {pipeline_mode = #tpu.pipeline_mode<synchronous>, transform_indices = @transform_4, window_bounds = array<i64: 1, 128>}, {pipeline_mode = #tpu.pipeline_mode<synchronous>, transform_indices = @transform_5, window_bounds = array<i64: 1, 128>}, {transform_indices = @transform_6, window_bounds = array<i64: 16, 128>}]} {
    %c0_i32 = arith.constant 0 : i32
    %0 = arith.cmpi eq, %arg1, %c0_i32 : i32
    %1 = arith.extui %0 : i1 to i32
    %c0_i32_0 = arith.constant 0 : i32
    %2 = arith.cmpi ne, %1, %c0_i32_0 : i32
    scf.if %2 {
      %cst_10 = arith.constant 0.000000e+00 : f32
      %12 = vector.broadcast %cst_10 : f32 to vector<16x128xf32>
      %c0_11 = arith.constant 0 : index
      %c0_12 = arith.constant 0 : index
      %13 = vector.load %arg9[%c0_11, %c0_12] : memref<16x128xf32, #tpu.memory_space<vmem>>, vector<16x128xf32>
      tpu.vector_store %arg9[%c0_11, %c0_12], %12 {strides = array<i32>} : memref<16x128xf32, #tpu.memory_space<vmem>>, vector<16x128xf32>,
    } else {
    }
    %c0 = arith.constant 0 : index
    %c0_1 = arith.constant 0 : index
    %3 = vector.load %arg9[%c0, %c0_1] : memref<16x128xf32, #tpu.memory_space<vmem>>, vector<16x128xf32>
    %c0_2 = arith.constant 0 : index
    %c0_3 = arith.constant 0 : index
    %4 = vector.load %arg2[%c0_2, %c0_3] : memref<16x128xf32, #tpu.memory_space<vmem>>, vector<16x128xf32>
    %c0_4 = arith.constant 0 : index
    %c0_5 = arith.constant 0 : index
    %5 = vector.load %arg4[%c0_4, %c0_5] : memref<128x128xf32, #tpu.memory_space<vmem>>, vector<128x128xf32>
    %cst = arith.constant dense<0.000000e+00> : vector<16x128xf32>
    %6 = tpu.matmul %4, %5, %cst {dimension_numbers = #tpu.dot_dimension_numbers<[1], [0], [0], [1], [0, 0, 1, 1], [], []>} : vector<16x128xf32>, vector<128x128xf32>, vector<16x128xf32> -> vector<16x128xf32>
    %7 = arith.addf %3, %6 : vector<16x128xf32>
    %c0_6 = arith.constant 0 : index
    %c0_7 = arith.constant 0 : index
    %8 = vector.load %arg9[%c0_6, %c0_7] : memref<16x128xf32, #tpu.memory_space<vmem>>, vector<16x128xf32>
    tpu.vector_store %arg9[%c0_6, %c0_7], %7 {strides = array<i32>} : memref<16x128xf32, #tpu.memory_space<vmem>>, vector<16x128xf32>,
    %c0_i32_8 = arith.constant 0 : i32
    %9 = arith.cmpi eq, %arg1, %c0_i32_8 : i32
    %10 = arith.extui %9 : i1 to i32
    %c0_i32_9 = arith.constant 0 : i32
    %11 = arith.cmpi ne, %10, %c0_i32_9 : i32
    scf.if %11 {
      %c0_10 = arith.constant 0 : index
      %c0_11 = arith.constant 0 : index
      %12 = vector.load %arg9[%c0_10, %c0_11] : memref<16x128xf32, #tpu.memory_space<vmem>>, vector<16x128xf32>
      %c0_12 = arith.constant 0 : index
      %c0_13 = arith.constant 0 : index
      %13 = vector.load %arg5[%c0_12, %c0_13] : memref<1x128xf32, #tpu.memory_space<vmem>>, vector<1x128xf32>
      %14 = vector.broadcast %13 : vector<1x128xf32> to vector<16x128xf32>
      %15 = arith.addf %12, %14 : vector<16x128xf32>
      %cst_14 = arith.constant dense<0.000000e+00> : vector<16xf32>
      %16 = vector.multi_reduction <add>, %15, %cst_14 [1] : vector<16x128xf32> to vector<16xf32>
      %17 = vector.shape_cast %16 : vector<16xf32> to vector<16x1xf32>
      %cst_15 = arith.constant 1.280000e+02 : f32
      %18 = vector.broadcast %cst_15 : f32 to vector<16x1xf32>
      %19 = arith.divf %17, %18 : vector<16x1xf32>
      %20 = vector.broadcast %19 : vector<16x1xf32> to vector<16x128xf32>
      %21 = arith.subf %15, %20 : vector<16x128xf32>
      %22 = arith.mulf %21, %21 : vector<16x128xf32>
      %cst_16 = arith.constant dense<0.000000e+00> : vector<16xf32>
      %23 = vector.multi_reduction <add>, %22, %cst_16 [1] : vector<16x128xf32> to vector<16xf32>
      %24 = vector.shape_cast %23 : vector<16xf32> to vector<16x1xf32>
      %cst_17 = arith.constant 1.270000e+02 : f32
      %25 = vector.broadcast %cst_17 : f32 to vector<16x1xf32>
      %26 = arith.divf %24, %25 : vector<16x1xf32>
      %27 = math.sqrt %26 : vector<16x1xf32>
      %cst_18 = arith.constant 9.99999997E-7 : f32
      %28 = vector.broadcast %cst_18 : f32 to vector<16x1xf32>
      %29 = arith.addf %27, %28 : vector<16x1xf32>
      %30 = tpu.reciprocal %29 {approx = true} : vector<16x1xf32> -> vector<16x1xf32>
      %c0_19 = arith.constant 0 : index
      %c0_20 = arith.constant 0 : index
      %31 = vector.load %arg6[%c0_19, %c0_20] : memref<1x128xf32, #tpu.memory_space<vmem>>, vector<1x128xf32>
      %32 = vector.broadcast %30 : vector<16x1xf32> to vector<16x128xf32>
      %33 = arith.mulf %21, %32 : vector<16x128xf32>
      %34 = vector.broadcast %31 : vector<1x128xf32> to vector<16x128xf32>
      %35 = arith.mulf %34, %33 : vector<16x128xf32>
      %c0_21 = arith.constant 0 : index
      %c0_22 = arith.constant 0 : index
      %36 = vector.load %arg7[%c0_21, %c0_22] : memref<1x128xf32, #tpu.memory_space<vmem>>, vector<1x128xf32>
      %37 = vector.broadcast %36 : vector<1x128xf32> to vector<16x128xf32>
      %38 = arith.addf %35, %37 : vector<16x128xf32>
      %c0_23 = arith.constant 0 : index
      %c0_24 = arith.constant 0 : index
      %39 = vector.load %arg3[%c0_23, %c0_24] : memref<16x128xf32, #tpu.memory_space<vmem>>, vector<16x128xf32>
      %40 = arith.addf %39, %38 : vector<16x128xf32>
      %c0_25 = arith.constant 0 : index
      %c0_26 = arith.constant 0 : index
      %41 = vector.load %arg8[%c0_25, %c0_26] : memref<16x128xf32, #tpu.memory_space<vmem>>, vector<16x128xf32>
      tpu.vector_store %arg8[%c0_25, %c0_26], %40 {strides = array<i32>} : memref<16x128xf32, #tpu.memory_space<vmem>>, vector<16x128xf32>,
    } else {
    }
    return
  }
  func.func @transform_0(%arg0: i32, %arg1: i32) -> (i32, i32) {
    %c0_i32 = arith.constant 0 : i32
    return %arg0, %arg1 : i32, i32
  }
  func.func @transform_1(%arg0: i32, %arg1: i32) -> (i32, i32) {
    %c0_i32 = arith.constant 0 : i32
    %c0_i32_0 = arith.constant 0 : i32
    return %arg0, %c0_i32 : i32, i32
  }
  func.func @transform_2(%arg0: i32, %arg1: i32) -> (i32, i32) {
    %c0_i32 = arith.constant 0 : i32
    %c0_i32_0 = arith.constant 0 : i32
    return %arg1, %c0_i32 : i32, i32
  }
  func.func @transform_3(%arg0: i32, %arg1: i32) -> (i32, i32) {
    %c0_i32 = arith.constant 0 : i32
    %c0_i32_0 = arith.constant 0 : i32
    %c0_i32_1 = arith.constant 0 : i32
    return %c0_i32, %c0_i32_0 : i32, i32
  }
  func.func @transform_4(%arg0: i32, %arg1: i32) -> (i32, i32) {
    %c0_i32 = arith.constant 0 : i32
    %c0_i32_0 = arith.constant 0 : i32
    %c0_i32_1 = arith.constant 0 : i32
    return %c0_i32, %c0_i32_0 : i32, i32
  }
  func.func @transform_5(%arg0: i32, %arg1: i32) -> (i32, i32) {
    %c0_i32 = arith.constant 0 : i32
    %c0_i32_0 = arith.constant 0 : i32
    %c0_i32_1 = arith.constant 0 : i32
    return %c0_i32, %c0_i32_0 : i32, i32
  }
  func.func @transform_6(%arg0: i32, %arg1: i32) -> (i32, i32) {
    %c0_i32 = arith.constant 0 : i32
    %c0_i32_0 = arith.constant 0 : i32
    return %arg0, %c0_i32 : i32, i32
  }
}

</mosaic_0001>

<bundles_post_ra>
// kernel: tpu_custom_call.1
= control target key start
LH: loop header
LB: loop body
LE: loop exit
PB: predicated region body
PF: predicated region fallthrough
CT: control target
= control target key end

     0   :  { %11 = vsyncpa [#allocation4], 0  ;;  %s450_s0 = inlined_call_operand.hbm [shape: f32[16,128], index: 0, kind: input, shape index: {}]   ;;  %s451_s1 = inlined_call_operand.hbm [shape: f32[16,128], index: 1, kind: input, shape index: {}]   ;;  %s452_s2 = inlined_call_operand.hbm [shape: f32[128,128], index: 2, kind: input, shape index: {}]   ;;  %s453_s3 = inlined_call_operand.vmem [shape: f32[1,128], index: 3, kind: input, shape index: {}]   ;;  %s454_s4 = inlined_call_operand.vmem [shape: f32[1,128], index: 4, kind: input, shape index: {}]   ;;  %s455_s5 = inlined_call_operand.vmem [shape: f32[1,128], index: 5, kind: input, shape index: {}]   ;;  %s456_s6 = inlined_call_operand.hbm [shape: f32[16,128], index: 6, kind: output, shape index: {}]  }
   0x1   :  { %12 = vsyncpa [#allocation7], 0 }
   0x2   :  { %13 = vsyncpa [#allocation5], 0  ;;  %s31_s23 = sshll.u32 %s451_s1, 4  ;;  %s374_s24 = smov [#allocation6]   ;;  %s32_s23 = int_to_ptr.hbm [resolvable:$true] %s31_s23 }
   0x3   :  { %s33_s25 = sshll.u32 %s374_s24, 4  ;;  %s18_s28 = sshll.u32 %s450_s0, 4  ;;  %s34_s25 = int_to_ptr.vmem [resolvable:$true] %s33_s25  ;;  %s19_s28 = int_to_ptr.hbm [resolvable:$true] %s18_s28 }
   0x4   :  { %s375_s29 = smov 128   ;;  %s376_s30 = smov 8  }
   0x5   :  { %39 = dma.hbm_to_vmem [thread:$0]  %s32_s23, 256, %s34_s25, [#allocation7], %s375_s29, %s375_s29, %s376_s30  }
   0x6   :  { %s377_s7 = smov [#allocation3]   ;;  %s44_s1 = sshll.u32 %s452_s2, 4  ;;  %s45_s1 = int_to_ptr.hbm [resolvable:$true] %s44_s1 }
   0x7   :  { %s20_s8 = sshll.u32 %s377_s7, 4  ;;  %s378_s0 = smov [#allocation8]   ;;  %s21_s8 = int_to_ptr.vmem [resolvable:$true] %s20_s8 }
   0x8   :  { %26 = dma.hbm_to_vmem [thread:$0]  %s19_s28, 256, %s21_s8, [#allocation4], %s375_s29, %s375_s29, %s376_s30  }
   0x9   :  { %s46_s11 = sshll.u32 %s378_s0, 4  ;;  %s47_s11 = int_to_ptr.vmem [resolvable:$true] %s46_s11 }
   0xa   :  { %52 = dma.hbm_to_vmem [thread:$0]  %s45_s1, 2048, %s47_s11, [#allocation7], %s375_s29, %s375_s29, %s376_s30  }
   0xb   :  { %368 = dma.done.wait [#allocation4], 256  }
   0xc   :  { %369 = vsyncadd [#allocation4], 4294967040 }
   0xd   :  { %370 = dma.done.wait [#allocation7], 2304  }
   0xe   :  { %371 = vsyncadd [#allocation7], 4294964992  ;;  %v96_v0 = vld [vmem:[#allocation8 + $0x78] sm:$0xff]  ;;  %v95_v1 = vld [vmem:[#allocation8 + $0x70] sm:$0xff]  ;;  %v379_v23 = vmov 128.0   ;;  %v380_v38 = vmov 127.0  }
   0xf   :  { %97 = vmatpush.msra.mxu0 %v96_v0  ;;  %233 = vmatpush.msra.mxu1 %v96_v0  ;;  %v94_v2 = vld [vmem:[#allocation8 + $0x68] sm:$0xff]  ;;  %v93_v3 = vld [vmem:[#allocation8 + $0x60] sm:$0xff]  ;;  %v92_v4 = vld [vmem:[#allocation8 + $0x58] sm:$0xff]  ;;  %260 = vrcp.f32 %v379_v23  ;;  %s381_s16 = smov [#allocation9]   ;;  %s219_s19 = sshll.u32 %s456_s6, 4  ;;  %s220_s19 = int_to_ptr.hbm [resolvable:$true] %s219_s19 }
  0x10   :  { %v91_v5 = vld [vmem:[#allocation8 + $0x50] sm:$0xff]  ;;  %v90_v6 = vld [vmem:[#allocation8 + $0x48] sm:$0xff]  ;;  %v89_v7 = vld [vmem:[#allocation8 + $0x40] sm:$0xff]  ;;  %262 = vrcp.f32 %v380_v38  ;;  %s217_s17 = sshll.u32 %s381_s16, 4  ;;  %s218_s17 = int_to_ptr.vmem [resolvable:$true] %s217_s17 }
  0x11   :  { %98 = vmatpush.msra.mxu0 %v95_v1  ;;  %234 = vmatpush.msra.mxu1 %v95_v1  ;;  %v88_v8 = vld [vmem:[#allocation8 + $0x38] sm:$0xff]  ;;  %v87_v9 = vld [vmem:[#allocation8 + $0x30] sm:$0xff]  ;;  %v86_v10 = vld [vmem:[#allocation8 + $0x28] sm:$0xff] }
  0x12   :  { %v85_v11 = vld [vmem:[#allocation8 + $0x20] sm:$0xff]  ;;  %v84_v12 = vld [vmem:[#allocation8 + $0x18] sm:$0xff]  ;;  %v83_v13 = vld [vmem:[#allocation8 + $0x10] sm:$0xff] }
  0x13   :  { %99 = vmatpush.msra.mxu0 %v94_v2  ;;  %235 = vmatpush.msra.mxu1 %v94_v2  ;;  %v82_v14 = vld [vmem:[#allocation8 + $0x8] sm:$0xff]  ;;  %v81_v15 = vld [vmem:[#allocation8] sm:$0xff] }
  0x14   :  { %v79_v16 = vld [vmem:[#allocation3] sm:$0xff]  ;;  %v80_v17 = vld [vmem:[#allocation3 + $0x8] sm:$0xff] }
  0x15   :  { %100 = vmatpush.msra.mxu0 %v93_v3  ;;  %236 = vmatpush.msra.mxu1 %v93_v3  ;;  %v257_v18 = vld [vmem:[%s453_s3] ss:$0 sm:$0xff]  ;;  %v261_v24 = vpop.eup %260 }
  0x16   :  { %v140_v25 = vmul.f32 128.0, %v261_v24  ;;  %vm144_vm0 = vweird.f32 %v261_v24  ;;  %v263_v39 = vpop.eup %262 }
  0x17   :  { %101 = vmatpush.msra.mxu0 %v92_v4  ;;  %237 = vmatpush.msra.mxu1 %v92_v4  ;;  %v157_v40 = vmul.f32 127.0, %v263_v39  ;;  %vm161_vm1 = vweird.f32 %v263_v39 }
  0x18   :  { %v141_v26 = vsub.f32 1.0, %v140_v25 }
  0x19   :  { %102 = vmatpush.msra.mxu0 %v91_v5  ;;  %238 = vmatpush.msra.mxu1 %v91_v5  ;;  %v158_v41 = vsub.f32 1.0, %v157_v40 }
  0x1a   :  { %v142_v27 = vmul.f32 %v261_v24, %v141_v26 }
  0x1b   :  { %103 = vmatpush.msra.mxu0 %v90_v6  ;;  %239 = vmatpush.msra.mxu1 %v90_v6  ;;  %v159_v42 = vmul.f32 %v263_v39, %v158_v41  ;;  %v258_v6 = vld [vmem:[%s454_s4] ss:$0 sm:$0xff] }
  0x1c   :  { %v143_v28 = vadd.f32 %v261_v24, %v142_v27 }
  0x1d   :  { %104 = vmatpush.msra.mxu0 %v89_v7  ;;  %240 = vmatpush.msra.mxu1 %v89_v7  ;;  %v160_v43 = vadd.f32 %v263_v39, %v159_v42 }
  0x1e   :  { %v145_v29 = vsel %vm144_vm0, %v261_v24, %v143_v28 }
  0x1f   :  { %105 = vmatpush.msra.mxu0 %v88_v8  ;;  %241 = vmatpush.msra.mxu1 %v88_v8  ;;  %v162_v44 = vsel %vm161_vm1, %v263_v39, %v160_v43 }
  0x21   :  { %106 = vmatpush.msra.mxu0 %v87_v9  ;;  %242 = vmatpush.msra.mxu1 %v87_v9 }
  0x23   :  { %107 = vmatpush.msra.mxu0 %v86_v10  ;;  %243 = vmatpush.msra.mxu1 %v86_v10  ;;  %v259_v10 = vld [vmem:[%s455_s5] ss:$0 sm:$0xff] }
  0x25   :  { %108 = vmatpush.msra.mxu0 %v85_v11  ;;  %244 = vmatpush.msra.mxu1 %v85_v11 }
  0x27   :  { %109 = vmatpush.msra.mxu0 %v84_v12  ;;  %245 = vmatpush.msra.mxu1 %v84_v12  ;;  %v207_v12 = vld [vmem:[#allocation6] sm:$0xff] }
  0x29   :  { %110 = vmatpush.msra.mxu0 %v83_v13  ;;  %246 = vmatpush.msra.mxu1 %v83_v13 }
  0x2b   :  { %111 = vmatpush.msra.mxu0 %v82_v14  ;;  %247 = vmatpush.msra.mxu1 %v82_v14 }
  0x2d   :  { %112 = vmatpush.msra.mxu0 %v81_v15  ;;  %248 = vmatpush.msra.mxu1 %v81_v15 }
  0x2e   :  { %113 = vmatmul.f32.vlgmr.msra.gmra.mxu0 %v79_v16  ;;  %116 = vmatmul.f32.vlgmr.msra.gmra.mxu1 %v80_v17 }
  0xab   :  { %v114_v19 = vpop.f32.mrf.mxu0  ;;  %v117_v21 = vpop.f32.mrf.mxu1 }
  0xac   :  { %v133_v20 = vadd.f32 %v257_v18, %v114_v19  ;;  %v134_v22 = vadd.f32 %v257_v18, %v117_v21  ;;  %v208_v18 = vld [vmem:[#allocation6 + $0x8] sm:$0xff] }
  0xae   :  { %135 = vadd.xlane.f32.xlu0 %v133_v20 }
  0xb6   :  { %137 = vadd.xlane.f32.xlu0 %v134_v22 }
 0x121   :  { %v136_v30 = vpop.xlane.xlu0 %135 }
 0x122   :  { %v146_v31 = vmul.f32 %v145_v29, %v136_v30 }
 0x124   :  { %v148_v32 = vsub.f32 %v133_v20, %v146_v31 }
 0x126   :  { %v150_v33 = vmul.f32 %v148_v32, %v148_v32 }
 0x128   :  { %152 = vadd.xlane.f32.xlu1 %v150_v33 }
 0x129   :  { %v138_v34 = vpop.xlane.xlu0 %137 }
 0x12a   :  { %v147_v35 = vmul.f32 %v145_v29, %v138_v34 }
 0x12c   :  { %v149_v36 = vsub.f32 %v134_v22, %v147_v35 }
 0x12e   :  { %v151_v37 = vmul.f32 %v149_v36, %v149_v36 }
 0x130   :  { %154 = vadd.xlane.f32.xlu1 %v151_v37 }
 0x19b   :  { %v153_v45 = vpop.xlane.xlu1 %152 }
 0x19c   :  { %v163_v46 = vmul.f32 %v162_v44, %v153_v45 }
 0x19e   :  { %264 = vrsqrt.f32 %v163_v46  ;;  %vm172_vm2 = vcmp.eq.f32.partialorder %v163_v46, inf  ;;  %v175_v59 = vand.u32 2147483648, %v163_v46  ;;  %vm174_vm3 = vcmp.eq.f32.partialorder %v163_v46, 0.0 }
 0x1a3   :  { %v155_v47 = vpop.xlane.xlu1 %154 }
 0x1a4   :  { %v265_v48 = vpop.eup %264  ;;  %v164_v49 = vmul.f32 %v162_v44, %v155_v47 }
 0x1a5   :  { %v166_v50 = vmul.f32 %v265_v48, %v163_v46 }
 0x1a6   :  { %266 = vrsqrt.f32 %v164_v49  ;;  %vm184_vm4 = vcmp.eq.f32.partialorder %v164_v49, inf  ;;  %v187_v3 = vand.u32 2147483648, %v164_v49  ;;  %vm186_vm5 = vcmp.eq.f32.partialorder %v164_v49, 0.0 }
 0x1a7   :  { %v167_v51 = vmul.f32 %v265_v48, %v166_v50 }
 0x1a9   :  { %v168_v52 = vmul.f32 0.5, %v167_v51 }
 0x1ab   :  { %v169_v53 = vsub.f32 1.5, %v168_v52 }
 0x1ac   :  { %v267_v54 = vpop.eup %266 }
 0x1ad   :  { %v170_v55 = vmul.f32 %v265_v48, %v169_v53  ;;  %v178_v56 = vmul.f32 %v267_v54, %v164_v49 }
 0x1af   :  { %v171_v57 = vmul.f32 %v170_v55, %v163_v46  ;;  %v179_v58 = vmul.f32 %v267_v54, %v178_v56 }
 0x1b1   :  { %v180_v60 = vmul.f32 0.5, %v179_v58  ;;  %v173_v61 = vsel %vm172_vm2, %v163_v46, %v171_v57 }
 0x1b2   :  { %v176_v62 = vsel %vm174_vm3, %v175_v59, %v173_v61 }
 0x1b3   :  { %v181_v63 = vsub.f32 1.5, %v180_v60  ;;  %v189_v0 = vadd.f32 1e-06, %v176_v62 }
 0x1b5   :  { %v182_v1 = vmul.f32 %v267_v54, %v181_v63  ;;  %268 = vrcp.f32 %v189_v0 }
 0x1b7   :  { %v183_v2 = vmul.f32 %v182_v1, %v164_v49 }
 0x1b9   :  { %v185_v4 = vsel %vm184_vm4, %v164_v49, %v183_v2 }
 0x1ba   :  { %v188_v5 = vsel %vm186_vm5, %v187_v3, %v185_v4 }
 0x1bb   :  { %v269_v7 = vpop.eup %268  ;;  %v190_v8 = vadd.f32 1e-06, %v188_v5 }
 0x1bc   :  { %v194_v9 = vmul.f32 %v269_v7, %v148_v32 }
 0x1bd   :  { %270 = vrcp.f32 %v190_v8 }
 0x1be   :  { %v199_v11 = vmul.f32 %v258_v6, %v194_v9 }
 0x1c0   :  { %v205_v13 = vadd.f32 %v259_v10, %v199_v11 }
 0x1c2   :  { %v209_v14 = vadd.f32 %v207_v12, %v205_v13 }
 0x1c3   :  { %v271_v15 = vpop.eup %270 }
 0x1c4   :  { %v195_v16 = vmul.f32 %v271_v15, %v149_v36  ;;  %211 = vst [vmem:[#allocation9] sm:$0xff] %v209_v14 }
 0x1c6   :  { %v200_v17 = vmul.f32 %v258_v6, %v195_v16 }
 0x1c8   :  { %v206_v19 = vadd.f32 %v259_v10, %v200_v17 }
 0x1ca   :  { %v210_v20 = vadd.f32 %v208_v18, %v206_v19 }
 0x1cc   :  { %212 = vst [vmem:[#allocation9 + $0x8] sm:$0xff] %v210_v20 }
 0x1cd   :  { %225 = dma.vmem_to_hbm [thread:$0]  %s218_s17, 256, %s220_s19, [#allocation5], %s375_s29, %s375_s29, %s376_s30  }
 0x1ce   :  { %372 = dma.done.wait [#allocation5], 256  }
 0x1cf   :  { %373 = vsyncadd [#allocation5], 4294967040 }
 0x1d0   :  { %230 = vsyncpa [#allocation4], 1 }
 0x1d1   :  { %231 = vsyncpa [#allocation7], 1 }
 0x1d2   :  { %232 = vsyncpa [#allocation5], 1 }

</bundles_post_ra>
